<compile_context>
chip_gen: v6e
topology: v6e:2x2x1
jax: 0.10.0
libtpu: 0.0.40
codegen_flags: <defaults>
</compile_context>

<pallas_src>
import jax
import jax.numpy as jnp
from jax.experimental import pallas as pl
from jax.experimental.pallas import tpu as pltpu

LANES = 128
NSPLIT = 2   # leading "parallel" grid axis -> 2 TensorCores on v7x; serial elsewhere


def _round_up(x, m):
    return ((x + m - 1) // m) * m


def _pick_block_rows():
    """Bigger blocks amortize the ~0.35 us fixed per-grid-step overhead.

    On v7x the per-TC HBM bandwidth (~3.2 TB/s) makes the fixed step cost
    proportionally worst, so use 8192-row (4 MiB) blocks there; its 64 MiB
    physical VMEM still holds 3 streams x 2 buffers x 4 MiB = 24 MiB easily.
    On v5e/v6e, 4096-row (2 MiB) blocks keep the double-buffered working set at
    ~12 MiB, comfortably inside even v5e's default scoped VMEM.
    """
    try:
        if pltpu.get_tpu_info().vmem_capacity_bytes <= (64 << 20):   # v7x-class
            return 8192
    except Exception:                                                # pragma: no cover
        pass
    return 4096


def _naccum(block_rows):
    """Number of independent (8,128) accumulator tiles per stream (<= 8)."""
    for n in (8, 4, 2, 1):
        if block_rows % (8 * n) == 0:
            return n
    return 1


def _softplus_neg(x):
    # Stable softplus(-x) == log(1 + exp(-x)) == BCEWithLogits(x, target=1),
    # matching PyTorch's stable formulation: max(-x,0) + log1p(exp(-|x|)).
    return jnp.maximum(-x, 0.0) + jnp.log1p(jnp.exp(-jnp.abs(x)))


def _flatten_lanes(x):
    """Flatten to (rows, 128) WITHOUT changing dtype.

    The flatten reshape is a no-copy bitcast for contiguous arrays; zero padding
    only happens when the element count is not a multiple of 128 (<=127 elems).
    With allow_input_fusion on the pallas_call, XLA may fuse that pad straight
    into the kernel's input DMA under jit, avoiding the extra HBM round-trip.
    Returns (2-D array, true element count).
    """
    flat = x.reshape(-1)
    n = flat.shape[0]
    rows = pl.cdiv(n, LANES)
    if n % LANES:
        # TODO(synk): if XLA declines to fuse, this still materializes one copy
        # of the padded stream for ragged element counts.
        flat = jnp.pad(flat, (0, rows * LANES - n))
    return flat.reshape(rows, LANES), n


# --------------------------------------------------------------------------
# Fused Pallas kernel: BCE-with-logits-vs-ones sum  +  L1 sum
# --------------------------------------------------------------------------
def _make_fused_kernel(block_rows_d, nblk_d, bpc_d, nd, nacc_d,
                       block_rows_g, nblk_g, bpc_g, ng, nacc_g):
    # All of these are Python ints (static at trace time).
    rows_full_d, rem_d = nd // LANES, nd % LANES
    rows_full_g, rem_g = ng // LANES, ng % LANES
    rows_d = pl.cdiv(nd, LANES)
    rows_g = pl.cdiv(ng, LANES)
    # Mask is needed only if the final lane-row is partially padded OR the final
    # block extends past the (padded) array and so contains unspecified rows.
    needs_mask_d = (rem_d != 0) or (rows_d % block_rows_d != 0)
    needs_mask_g = (rem_g != 0) or (rows_g % block_rows_g != 0)

    def _tail_mask(block_rows, row_offset, rows_full, rem):
        # 2-D (row, col) comparison: no flat-index int32 overflow.
        row = jax.lax.broadcasted_iota(jnp.int32, (block_rows, LANES), 0) + row_offset
        col = jax.lax.broadcasted_iota(jnp.int32, (block_rows, LANES), 1)
        return (row < rows_full) | ((row == rows_full) & (col < rem))

    def _block_partial(v, block_rows, nacc):
        # (block_rows, 128) -> (1, nacc*8, 128): nacc independent accumulation
        # chains (every slice is a whole number of (8,128) vreg tiles), so the
        # reduce stays VPU-throughput-bound instead of one long latency chain.
        return v.reshape(block_rows // (8 * nacc), nacc * 8, LANES).sum(
            axis=0).reshape(1, nacc * 8, LANES)

    def kernel(d_ref, g_ref, t_ref, adv_ref, l1_ref):
        c = pl.program_id(0)      # split (TensorCore on v7x)
        i = pl.program_id(1)      # reduction step within the split

        @pl.when(i == 0)
        def _init():
            adv_ref[...] = jnp.zeros_like(adv_ref)
            l1_ref[...] = jnp.zeros_like(l1_ref)

        gb = c * bpc_g + i        # global block index of the G/target stream
        db = c * bpc_d + i        # global block index of the D stream
        g_owned = jnp.logical_and(i < bpc_g, gb < nblk_g)
        d_owned = jnp.logical_and(i < bpc_d, db < nblk_d)

        def accum_l1(masked):
            diff = jnp.abs(g_ref[...].astype(jnp.float32)
                           - t_ref[...].astype(jnp.float32))
            if masked:
                m = _tail_mask(block_rows_g, (nblk_g - 1) * block_rows_g,
                               rows_full_g, rem_g)
                diff = jnp.where(m, diff, 0.0)   # keep as select, NOT multiply
            l1_ref[...] += _block_partial(diff, block_rows_g, nacc_g)

        def accum_bce(masked):
            v = _softplus_neg(d_ref[...].astype(jnp.float32))
            if masked:
                m = _tail_mask(block_rows_d, (nblk_d - 1) * block_rows_d,
                               rows_full_d, rem_d)
                v = jnp.where(m, v, 0.0)         # keep as select, NOT multiply
            adv_ref[...] += _block_partial(v, block_rows_d, nacc_d)

        # ----- G / target stream -----
        if needs_mask_g:
            @pl.when(jnp.logical_and(g_owned, gb < nblk_g - 1))
            def _l1_main():
                accum_l1(False)

            @pl.when(jnp.logical_and(g_owned, gb == nblk_g - 1))
            def _l1_tail():
                accum_l1(True)
        else:
            # No padded lanes and no padded rows: never generate mask code.
            @pl.when(g_owned)
            def _l1_all():
                accum_l1(False)

        # ----- D stream -----
        if needs_mask_d:
            @pl.when(jnp.logical_and(d_owned, db < nblk_d - 1))
            def _bce_main():
                accum_bce(False)

            @pl.when(jnp.logical_and(d_owned, db == nblk_d - 1))
            def _bce_tail():
                accum_bce(True)
        else:
            @pl.when(d_owned)
            def _bce_all():
                accum_bce(False)

    return kernel


def adv_and_recon_sums(d_out, g_out, target):
    """Returns (sum(softplus(-d_out)), sum(|g_out - target|), d_count, g_count)."""
    d2, nd = _flatten_lanes(d_out)
    g2, ng = _flatten_lanes(g_out)
    t2, nt = _flatten_lanes(target)
    assert ng == nt, "generator output and target must have the same element count"

    default_rows = _pick_block_rows()
    rows_d, rows_g = d2.shape[0], g2.shape[0]
    block_rows_d = min(default_rows, _round_up(rows_d, 8))
    block_rows_g = min(default_rows, _round_up(rows_g, 8))
    nblk_d = pl.cdiv(rows_d, block_rows_d)
    nblk_g = pl.cdiv(rows_g, block_rows_g)
    bpc_d = pl.cdiv(nblk_d, NSPLIT)     # blocks per split
    bpc_g = pl.cdiv(nblk_g, NSPLIT)
    steps = max(bpc_d, bpc_g)
    nacc_d = _naccum(block_rows_d)
    nacc_g = _naccum(block_rows_g)

    kernel = _make_fused_kernel(block_rows_d, nblk_d, bpc_d, nd, nacc_d,
                                block_rows_g, nblk_g, bpc_g, ng, nacc_g)

    # Clamp the step index within a split AND the global block index: steps a
    # split does not own keep the SAME block index as its last owned step, so the
    # pipeline elides the redundant DMA (and nothing ever reads out of bounds).
    # The in-kernel `owned` guards skip the corresponding accumulation.
    d_map = lambda c, i: (
        jnp.minimum(c * bpc_d + jnp.minimum(i, bpc_d - 1), nblk_d - 1), 0)
    g_map = lambda c, i: (
        jnp.minimum(c * bpc_g + jnp.minimum(i, bpc_g - 1), nblk_g - 1), 0)
    o_map = lambda c, i: (c, 0, 0)

    itemsize = lambda a: jnp.dtype(a.dtype).itemsize
    in_block_bytes = LANES * (block_rows_d * itemsize(d2)
                              + block_rows_g * (itemsize(g2) + itemsize(t2)))
    out_bytes = NSPLIT * 8 * LANES * 4 * (nacc_d + nacc_g)
    # Double-buffered inputs + resident outputs + headroom; floor at 32 MiB,
    # cap at v7x physical (64 MiB).
    vmem_limit = int(min(max(2 * in_block_bytes + 2 * out_bytes + (8 << 20),
                             32 << 20), 64 << 20))

    cost = pl.CostEstimate(
        flops=int(6 * nd + 2 * ng),
        transcendentals=int(2 * nd),
        bytes_accessed=int(nd * itemsize(d2)
                           + ng * (itemsize(g2) + itemsize(t2))
                           + 2 * out_bytes),
    )

    adv_part, l1_part = pl.pallas_call(
        kernel,
        out_shape=(jax.ShapeDtypeStruct((NSPLIT, nacc_d * 8, LANES), jnp.float32),
                   jax.ShapeDtypeStruct((NSPLIT, nacc_g * 8, LANES), jnp.float32)),
        grid_spec=pltpu.PrefetchScalarGridSpec(
            num_scalar_prefetch=0,
            grid=(NSPLIT, steps),
            in_specs=[
                pl.BlockSpec((block_rows_d, LANES), d_map),
                pl.BlockSpec((block_rows_g, LANES), g_map),
                pl.BlockSpec((block_rows_g, LANES), g_map),
            ],
            out_specs=(
                pl.BlockSpec((1, nacc_d * 8, LANES), o_map),
                pl.BlockSpec((1, nacc_g * 8, LANES), o_map),
            ),
        ),
        compiler_params=pltpu.CompilerParams(
            dimension_semantics=("parallel", "arbitrary"),
            vmem_limit_bytes=vmem_limit,
            allow_input_fusion=[True, True, True],
        ),
        cost_estimate=cost,
    )(d2, g2, t2)

    # Tiny per-split partials -> scalars in plain JAX.
    return jnp.sum(adv_part), jnp.sum(l1_part), nd, ng


# --------------------------------------------------------------------------
# GenLossWithSober forward (Pallas-backed losses)
# --------------------------------------------------------------------------
def gen_loss_with_sober(inp, gen, disc, target_image, lambda_reg):
    g_out = gen(inp)
    d_out = disc(g_out, inp)
    adv_sum, l1_sum, nd, ng = adv_and_recon_sums(d_out, g_out, target_image)
    adv_loss = adv_sum / jnp.float32(nd)
    recon_loss = l1_sum / jnp.float32(ng)
    combined_loss = adv_loss + jnp.float32(lambda_reg) * recon_loss
    return combined_loss, adv_loss, recon_loss


# --------------------------------------------------------------------------
# Synthetic deterministic generator / discriminator (plain-JAX glue;
# they are external callables passed into the PyTorch module, not part of it)
# --------------------------------------------------------------------------
def _conv2d_nchw(x, w, b):
    y = jax.lax.conv_general_dilated(
        x, w, window_strides=(1, 1), padding="SAME",
        dimension_numbers=("NCHW", "OIHW", "NCHW"))
    return y + b[None, :, None, None]


def _make_conv_params(key, c_out, c_in, k=3):
    k1, k2 = jax.random.split(key)
    w = 0.1 * jax.random.normal(k1, (c_out, c_in, k, k), jnp.float32)
    b = 0.1 * jax.random.normal(k2, (c_out,), jnp.float32)
    return w, b


if __name__ == "__main__":
    key = jax.random.PRNGKey(0)
    k_in, k_tgt, k_gen, k_disc = jax.random.split(key, 4)

    B, C, H, W = 2, 4, 16, 16
    x = jax.random.normal(k_in, (B, C, H, W), jnp.float32)
    target_image = jax.random.normal(k_tgt, (B, C, H, W), jnp.float32)

    wg, bg = _make_conv_params(k_gen, C, C)          # generator: C -> C
    wd, bd = _make_conv_params(k_disc, 1, 2 * C)     # disc: concat(G,x) -> 1 logit map

    def gen(inp):
        return jnp.tanh(_conv2d_nchw(inp, wg, bg))

    def disc(g_out, inp):
        return _conv2d_nchw(jnp.concatenate([g_out, inp], axis=1), wd, bd)

    lambda_reg = 100.0
    loss_fn = jax.jit(
        lambda xi, ti: gen_loss_with_sober(xi, gen, disc, ti, lambda_reg))
    combined, adv, recon = loss_fn(x, target_image)
    combined, adv, recon = jax.block_until_ready((combined, adv, recon))

    # Pure-JAX reference check of the loss math.
    g_ref = gen(x)
    d_ref = disc(g_ref, x)
    adv_ref = jnp.mean(jnp.maximum(-d_ref, 0.0) + jnp.log1p(jnp.exp(-jnp.abs(d_ref))))
    recon_ref = jnp.mean(jnp.abs(g_ref - target_image))
    comb_ref = adv_ref + lambda_reg * recon_ref
    assert jnp.allclose(adv, adv_ref, rtol=1e-5, atol=1e-6)
    assert jnp.allclose(recon, recon_ref, rtol=1e-5, atol=1e-6)
    assert jnp.allclose(combined, comb_ref, rtol=1e-5, atol=1e-5)

    # Secondary check: ragged element counts (not a multiple of 128),
    # tail-mask path (padded lanes + padded rows) exercised.
    kb1, kb2, kb3 = jax.random.split(jax.random.PRNGKey(1), 3)
    d_big = jax.random.normal(kb1, (4, 1, 127, 199), jnp.float32)
    g_big = jax.random.normal(kb2, (4, 3, 127, 199), jnp.float32)
    t_big = jax.random.normal(kb3, (4, 3, 127, 199), jnp.float32)
    adv_sum_b, l1_sum_b, nd_b, ng_b = adv_and_recon_sums(d_big, g_big, t_big)
    adv_b = adv_sum_b / jnp.float32(nd_b)
    rec_b = l1_sum_b / jnp.float32(ng_b)
    adv_b, rec_b = jax.block_until_ready((adv_b, rec_b))
    adv_b_ref = jnp.mean(jnp.maximum(-d_big, 0.0) + jnp.log1p(jnp.exp(-jnp.abs(d_big))))
    rec_b_ref = jnp.mean(jnp.abs(g_big - t_big))
    assert jnp.allclose(adv_b, adv_b_ref, rtol=1e-4, atol=1e-5)
    assert jnp.allclose(rec_b, rec_b_ref, rtol=1e-4, atol=1e-5)

    # Tertiary check: multi-block streams, both splits active, multi-accumulator
    # (nacc > 1) reduction path, unequal D vs G block counts.
    kc1, kc2, kc3 = jax.random.split(jax.random.PRNGKey(2), 3)
    d_m = jax.random.normal(kc1, (2, 1, 512, 512), jnp.float32)
    g_m = jax.random.normal(kc2, (2, 3, 512, 512), jnp.float32)
    t_m = jax.random.normal(kc3, (2, 3, 512, 512), jnp.float32)
    adv_sum_m, l1_sum_m, nd_m, ng_m = adv_and_recon_sums(d_m, g_m, t_m)
    adv_m = adv_sum_m / jnp.float32(nd_m)
    rec_m = l1_sum_m / jnp.float32(ng_m)
    adv_m, rec_m = jax.block_until_ready((adv_m, rec_m))
    adv_m_ref = jnp.mean(jnp.maximum(-d_m, 0.0) + jnp.log1p(jnp.exp(-jnp.abs(d_m))))
    rec_m_ref = jnp.mean(jnp.abs(g_m - t_m))
    assert jnp.allclose(adv_m, adv_m_ref, rtol=1e-4, atol=1e-5)
    assert jnp.allclose(rec_m, rec_m_ref, rtol=1e-4, atol=1e-5)

    print("KERNEL_OK")
</pallas_src>

<mosaic_0001>
module attributes {stable_mosaic.version = 11 : i64} {
  func.func @kernel(%arg0: i32, %arg1: i32, %arg2: memref<8x128xf32, #tpu.memory_space<vmem>>, %arg3: memref<16x128xf32, #tpu.memory_space<vmem>>, %arg4: memref<16x128xf32, #tpu.memory_space<vmem>>, %arg5: memref<1x8x128xf32, #tpu.memory_space<vmem>>, %arg6: memref<1x16x128xf32, #tpu.memory_space<vmem>>) attributes {dimension_semantics = [#tpu.dimension_semantics<parallel>, #tpu.dimension_semantics<arbitrary>], iteration_bounds = array<i64: 2, 1>, scalar_prefetch = 0 : i64, scratch_operands = 0 : i64, tpu.core_type = #tpu.core_type<tc>, window_params = [{transform_indices = @transform_0, window_bounds = array<i64: 8, 128>}, {transform_indices = @transform_1, window_bounds = array<i64: 16, 128>}, {transform_indices = @transform_2, window_bounds = array<i64: 16, 128>}, {transform_indices = @transform_3, window_bounds = array<i64: 1, 8, 128>}, {transform_indices = @transform_4, window_bounds = array<i64: 1, 16, 128>}]} {
    %c0_i32 = arith.constant 0 : i32
    %0 = arith.cmpi eq, %arg1, %c0_i32 : i32
    %1 = arith.extui %0 : i1 to i32
    %c0_i32_0 = arith.constant 0 : i32
    %2 = arith.cmpi ne, %1, %c0_i32_0 : i32
    scf.if %2 {
      %cst = arith.constant 0.000000e+00 : f32
      %23 = vector.broadcast %cst : f32 to vector<1x8x128xf32>
      %c0 = arith.constant 0 : index
      %c0_11 = arith.constant 0 : index
      %c0_12 = arith.constant 0 : index
      %24 = vector.load %arg5[%c0, %c0_11, %c0_12] : memref<1x8x128xf32, #tpu.memory_space<vmem>>, vector<1x8x128xf32>
      tpu.vector_store %arg5[%c0, %c0_11, %c0_12], %23 {strides = array<i32>} : memref<1x8x128xf32, #tpu.memory_space<vmem>>, vector<1x8x128xf32>,
      %cst_13 = arith.constant 0.000000e+00 : f32
      %25 = vector.broadcast %cst_13 : f32 to vector<1x16x128xf32>
      %c0_14 = arith.constant 0 : index
      %c0_15 = arith.constant 0 : index
      %c0_16 = arith.constant 0 : index
      %26 = vector.load %arg6[%c0_14, %c0_15, %c0_16] : memref<1x16x128xf32, #tpu.memory_space<vmem>>, vector<1x16x128xf32>
      tpu.vector_store %arg6[%c0_14, %c0_15, %c0_16], %25 {strides = array<i32>} : memref<1x16x128xf32, #tpu.memory_space<vmem>>, vector<1x16x128xf32>,
    } else {
    }
    %c1_i32 = arith.constant 1 : i32
    %3 = arith.muli %arg0, %c1_i32 : i32
    %4 = arith.addi %3, %arg1 : i32
    %c1_i32_1 = arith.constant 1 : i32
    %5 = arith.muli %arg0, %c1_i32_1 : i32
    %6 = arith.addi %5, %arg1 : i32
    %c1_i32_2 = arith.constant 1 : i32
    %7 = arith.cmpi slt, %arg1, %c1_i32_2 : i32
    %c1_i32_3 = arith.constant 1 : i32
    %8 = arith.cmpi slt, %4, %c1_i32_3 : i32
    %9 = arith.andi %7, %8 : i1
    %c1_i32_4 = arith.constant 1 : i32
    %10 = arith.cmpi slt, %arg1, %c1_i32_4 : i32
    %c1_i32_5 = arith.constant 1 : i32
    %11 = arith.cmpi slt, %6, %c1_i32_5 : i32
    %12 = arith.andi %10, %11 : i1
    %13 = arith.extui %9 : i1 to i32
    %c0_i32_6 = arith.constant 0 : i32
    %14 = arith.cmpi ne, %13, %c0_i32_6 : i32
    scf.if %14 {
      %c0 = arith.constant 0 : index
      %c0_11 = arith.constant 0 : index
      %23 = vector.load %arg3[%c0, %c0_11] : memref<16x128xf32, #tpu.memory_space<vmem>>, vector<16x128xf32>
      %c0_12 = arith.constant 0 : index
      %c0_13 = arith.constant 0 : index
      %24 = vector.load %arg4[%c0_12, %c0_13] : memref<16x128xf32, #tpu.memory_space<vmem>>, vector<16x128xf32>
      %25 = arith.subf %23, %24 : vector<16x128xf32>
      %26 = math.absf %25 : vector<16x128xf32>
      %c0_14 = arith.constant 0 : index
      %c0_15 = arith.constant 0 : index
      %c0_16 = arith.constant 0 : index
      %27 = vector.load %arg6[%c0_14, %c0_15, %c0_16] : memref<1x16x128xf32, #tpu.memory_space<vmem>>, vector<1x16x128xf32>
      %28 = vector.shape_cast %26 : vector<16x128xf32> to vector<1x16x128xf32>
      %cst = arith.constant dense<0.000000e+00> : vector<16x128xf32>
      %29 = vector.multi_reduction <add>, %28, %cst [0] : vector<1x16x128xf32> to vector<16x128xf32>
      %30 = vector.shape_cast %29 : vector<16x128xf32> to vector<1x16x128xf32>
      %31 = arith.addf %27, %30 : vector<1x16x128xf32>
      %c0_17 = arith.constant 0 : index
      %c0_18 = arith.constant 0 : index
      %c0_19 = arith.constant 0 : index
      %32 = vector.load %arg6[%c0_17, %c0_18, %c0_19] : memref<1x16x128xf32, #tpu.memory_space<vmem>>, vector<1x16x128xf32>
      tpu.vector_store %arg6[%c0_17, %c0_18, %c0_19], %31 {strides = array<i32>} : memref<1x16x128xf32, #tpu.memory_space<vmem>>, vector<1x16x128xf32>,
    } else {
    }
    %c0_i32_7 = arith.constant 0 : i32
    %15 = arith.cmpi slt, %6, %c0_i32_7 : i32
    %16 = arith.andi %12, %15 : i1
    %17 = arith.extui %16 : i1 to i32
    %c0_i32_8 = arith.constant 0 : i32
    %18 = arith.cmpi ne, %17, %c0_i32_8 : i32
    scf.if %18 {
      %c0 = arith.constant 0 : index
      %c0_11 = arith.constant 0 : index
      %23 = vector.load %arg2[%c0, %c0_11] : memref<8x128xf32, #tpu.memory_space<vmem>>, vector<8x128xf32>
      %cst = arith.constant 0.000000e+00 : f32
      %24 = vector.broadcast %cst : f32 to vector<8x128xf32>
      %25 = arith.subf %24, %23 : vector<8x128xf32>
      %cst_12 = arith.constant 0.000000e+00 : f32
      %26 = vector.broadcast %cst_12 : f32 to vector<8x128xf32>
      %27 = arith.maximumf %25, %26 : vector<8x128xf32>
      %28 = math.absf %23 : vector<8x128xf32>
      %cst_13 = arith.constant 0.000000e+00 : f32
      %29 = vector.broadcast %cst_13 : f32 to vector<8x128xf32>
      %30 = arith.subf %29, %28 : vector<8x128xf32>
      %31 = math.exp %30 : vector<8x128xf32>
      %32 = math.log1p %31 : vector<8x128xf32>
      %33 = arith.addf %27, %32 : vector<8x128xf32>
      %c0_14 = arith.constant 0 : index
      %c0_15 = arith.constant 0 : index
      %c0_16 = arith.constant 0 : index
      %34 = vector.load %arg5[%c0_14, %c0_15, %c0_16] : memref<1x8x128xf32, #tpu.memory_space<vmem>>, vector<1x8x128xf32>
      %35 = vector.shape_cast %33 : vector<8x128xf32> to vector<1x8x128xf32>
      %cst_17 = arith.constant dense<0.000000e+00> : vector<8x128xf32>
      %36 = vector.multi_reduction <add>, %35, %cst_17 [0] : vector<1x8x128xf32> to vector<8x128xf32>
      %37 = vector.shape_cast %36 : vector<8x128xf32> to vector<1x8x128xf32>
      %38 = arith.addf %34, %37 : vector<1x8x128xf32>
      %c0_18 = arith.constant 0 : index
      %c0_19 = arith.constant 0 : index
      %c0_20 = arith.constant 0 : index
      %39 = vector.load %arg5[%c0_18, %c0_19, %c0_20] : memref<1x8x128xf32, #tpu.memory_space<vmem>>, vector<1x8x128xf32>
      tpu.vector_store %arg5[%c0_18, %c0_19, %c0_20], %38 {strides = array<i32>} : memref<1x8x128xf32, #tpu.memory_space<vmem>>, vector<1x8x128xf32>,
    } else {
    }
    %c0_i32_9 = arith.constant 0 : i32
    %19 = arith.cmpi eq, %6, %c0_i32_9 : i32
    %20 = arith.andi %12, %19 : i1
    %21 = arith.extui %20 : i1 to i32
    %c0_i32_10 = arith.constant 0 : i32
    %22 = arith.cmpi ne, %21, %c0_i32_10 : i32
    scf.if %22 {
      %c0 = arith.constant 0 : index
      %c0_11 = arith.constant 0 : index
      %23 = vector.load %arg2[%c0, %c0_11] : memref<8x128xf32, #tpu.memory_space<vmem>>, vector<8x128xf32>
      %cst = arith.constant 0.000000e+00 : f32
      %24 = vector.broadcast %cst : f32 to vector<8x128xf32>
      %25 = arith.subf %24, %23 : vector<8x128xf32>
      %cst_12 = arith.constant 0.000000e+00 : f32
      %26 = vector.broadcast %cst_12 : f32 to vector<8x128xf32>
      %27 = arith.maximumf %25, %26 : vector<8x128xf32>
      %28 = math.absf %23 : vector<8x128xf32>
      %cst_13 = arith.constant 0.000000e+00 : f32
      %29 = vector.broadcast %cst_13 : f32 to vector<8x128xf32>
      %30 = arith.subf %29, %28 : vector<8x128xf32>
      %31 = math.exp %30 : vector<8x128xf32>
      %32 = math.log1p %31 : vector<8x128xf32>
      %33 = arith.addf %27, %32 : vector<8x128xf32>
      %34 = tpu.iota {dimensions = array<i32: 0>} : vector<8x128xi32>
      %c0_i32_14 = arith.constant 0 : i32
      %35 = vector.broadcast %c0_i32_14 : i32 to vector<8x128xi32>
      %36 = arith.addi %34, %35 : vector<8x128xi32>
      %37 = tpu.iota {dimensions = array<i32: 1>} : vector<8x128xi32>
      %c4_i32 = arith.constant 4 : i32
      %38 = vector.broadcast %c4_i32 : i32 to vector<8x128xi32>
      %39 = arith.cmpi slt, %36, %38 : vector<8x128xi32>
      %c4_i32_15 = arith.constant 4 : i32
      %40 = vector.broadcast %c4_i32_15 : i32 to vector<8x128xi32>
      %41 = arith.cmpi eq, %36, %40 : vector<8x128xi32>
      %c0_i32_16 = arith.constant 0 : i32
      %42 = vector.broadcast %c0_i32_16 : i32 to vector<8x128xi32>
      %43 = arith.cmpi slt, %37, %42 : vector<8x128xi32>
      %44 = arith.andi %41, %43 : vector<8x128xi1>
      %45 = arith.ori %39, %44 : vector<8x128xi1>
      %cst_17 = arith.constant 0.000000e+00 : f32
      %46 = vector.broadcast %cst_17 : f32 to vector<8x128xf32>
      %47 = arith.select %45, %33, %46 : vector<8x128xi1>, vector<8x128xf32>
      %c0_18 = arith.constant 0 : index
      %c0_19 = arith.constant 0 : index
      %c0_20 = arith.constant 0 : index
      %48 = vector.load %arg5[%c0_18, %c0_19, %c0_20] : memref<1x8x128xf32, #tpu.memory_space<vmem>>, vector<1x8x128xf32>
      %49 = vector.shape_cast %47 : vector<8x128xf32> to vector<1x8x128xf32>
      %cst_21 = arith.constant dense<0.000000e+00> : vector<8x128xf32>
      %50 = vector.multi_reduction <add>, %49, %cst_21 [0] : vector<1x8x128xf32> to vector<8x128xf32>
      %51 = vector.shape_cast %50 : vector<8x128xf32> to vector<1x8x128xf32>
      %52 = arith.addf %48, %51 : vector<1x8x128xf32>
      %c0_22 = arith.constant 0 : index
      %c0_23 = arith.constant 0 : index
      %c0_24 = arith.constant 0 : index
      %53 = vector.load %arg5[%c0_22, %c0_23, %c0_24] : memref<1x8x128xf32, #tpu.memory_space<vmem>>, vector<1x8x128xf32>
      tpu.vector_store %arg5[%c0_22, %c0_23, %c0_24], %52 {strides = array<i32>} : memref<1x8x128xf32, #tpu.memory_space<vmem>>, vector<1x8x128xf32>,
    } else {
    }
    return
  }
  func.func @transform_0(%arg0: i32, %arg1: i32) -> (i32, i32) {
    %c1_i32 = arith.constant 1 : i32
    %0 = arith.muli %arg0, %c1_i32 : i32
    %c0_i32 = arith.constant 0 : i32
    %1 = arith.minsi %arg1, %c0_i32 : i32
    %2 = arith.addi %0, %1 : i32
    %c0_i32_0 = arith.constant 0 : i32
    %3 = arith.minsi %2, %c0_i32_0 : i32
    %c0_i32_1 = arith.constant 0 : i32
    %c0_i32_2 = arith.constant 0 : i32
    return %3, %c0_i32_1 : i32, i32
  }
  func.func @transform_1(%arg0: i32, %arg1: i32) -> (i32, i32) {
    %c1_i32 = arith.constant 1 : i32
    %0 = arith.muli %arg0, %c1_i32 : i32
    %c0_i32 = arith.constant 0 : i32
    %1 = arith.minsi %arg1, %c0_i32 : i32
    %2 = arith.addi %0, %1 : i32
    %c0_i32_0 = arith.constant 0 : i32
    %3 = arith.minsi %2, %c0_i32_0 : i32
    %c0_i32_1 = arith.constant 0 : i32
    %c0_i32_2 = arith.constant 0 : i32
    return %3, %c0_i32_1 : i32, i32
  }
  func.func @transform_2(%arg0: i32, %arg1: i32) -> (i32, i32) {
    %c1_i32 = arith.constant 1 : i32
    %0 = arith.muli %arg0, %c1_i32 : i32
    %c0_i32 = arith.constant 0 : i32
    %1 = arith.minsi %arg1, %c0_i32 : i32
    %2 = arith.addi %0, %1 : i32
    %c0_i32_0 = arith.constant 0 : i32
    %3 = arith.minsi %2, %c0_i32_0 : i32
    %c0_i32_1 = arith.constant 0 : i32
    %c0_i32_2 = arith.constant 0 : i32
    return %3, %c0_i32_1 : i32, i32
  }
  func.func @transform_3(%arg0: i32, %arg1: i32) -> (i32, i32, i32) {
    %c0_i32 = arith.constant 0 : i32
    %c0_i32_0 = arith.constant 0 : i32
    %c0_i32_1 = arith.constant 0 : i32
    return %arg0, %c0_i32, %c0_i32_0 : i32, i32, i32
  }
  func.func @transform_4(%arg0: i32, %arg1: i32) -> (i32, i32, i32) {
    %c0_i32 = arith.constant 0 : i32
    %c0_i32_0 = arith.constant 0 : i32
    %c0_i32_1 = arith.constant 0 : i32
    return %arg0, %c0_i32, %c0_i32_0 : i32, i32, i32
  }
}

</mosaic_0001>

<bundles_post_ra>
// kernel: _lambda_.1
= control target key start
LH: loop header
LB: loop body
LE: loop exit
PB: predicated region body
PF: predicated region fallthrough
CT: control target
= control target key end

     0   :  { %s694_s15 = smov 0   ;;  %s696_s16 = smov 0   ;;  %s766_s0 = inlined_call_operand.vmem [shape: f32[4,128], index: 0, kind: input, shape index: {}]   ;;  %s767_s1 = inlined_call_operand.vmem [shape: f32[16,128], index: 1, kind: input, shape index: {}]   ;;  %s768_s2 = inlined_call_operand.vmem [shape: f32[16,128], index: 2, kind: input, shape index: {}]   ;;  %s769_s3 = inlined_call_operand.vmem [shape: f32[2,8,128], index: 3, kind: output, shape index: {0}]   ;;  %s770_s4 = inlined_call_operand.vmem [shape: f32[2,16,128], index: 4, kind: output, shape index: {1}]  }
   0x1   :  { %s698_s17 = smov 0  }
   0x2 LB: > { %s27_s18 = sadd.s32 1, %s662_s16  ;;  %p596_p0 = scmp.ge.s32.totalorder %s666_s17, 1  ;;  %s666_s17 = sphi %s698_s17, %s15_s17   ;;  %s662_s16 = sphi %s696_s16, %s772_s16   ;;  %s658_s15 = sphi %s694_s15, %s771_s15  }
   0x3   : > { %p29_p1 = scmp.ge.s32.totalorder %s27_s18, 2  ;;  %p264_p2 = scmp.lt.s32.totalorder %s666_s17, 3 }
   0x5   : > { %s774_s18 = smov (%p29_p1, %s27_s18), 0  ;;  %p265_p3 = pnand %p596_p0, %p264_p2 }
   0x6   : > { %p324_p4 = scmp.lt.s32.totalorder (!%p265_p3), %s658_s15, 0  ;;  %p373_p5 = scmp.lt.s32.totalorder (!%p265_p3), %s658_s15, 1 }
   0x7   : > { %268 = sbr.rel (%p265_p3) target bundleno = 140 (0x8c), region = 32 }
   0xc   : > { %s325_s19 = scalar_select %p324_p4, %s658_s15, 0  ;;  %v668_v0 = vmov 0.0  }
   0xd   : > { %s374_s20 = scalar_select %p373_p5, %s658_s15, 1 }
   0xe   : > { %s597_s21 = sshll.u32 %s325_s19, 1 }
   0xf   : > { %p329_p6 = scmp.lt.s32.totalorder %s597_s21, 0  ;;  %p347_p7 = scmp.lt.s32.totalorder %s597_s21, 1 }
  0x10   : > { %s603_s22 = sshll.u32 %s374_s20, 3  ;;  %s609_s23 = sshll.u32 %s374_s20, 4 }
  0x11   : > { %s330_s24 = scalar_select %p329_p6, %s597_s21, 0 }
  0x12   : > { %s776_s21 = smov (!%p347_p7, %s597_s21), 1  ;;  %s725_s28 = scalar_lea.vmem %s769_s3, %s603_s22 }
  0x13   : > { %s598_s25 = sshll.u32 %s330_s24, 2  ;;  %s600_s6 = sshll.u32 %s776_s21, 3  ;;  %386 = vst [vmem:[%s725_s28] sm:$0xff] %v668_v0 }
  0x14   : > { %s730_s5 = scalar_lea.vmem %s766_s0, %s598_s25  ;;  %s350_s9 = scalar_lea.vmem %s767_s1, %s600_s6 }
  0x15   : > { %s366_s12 = scalar_lea.vmem %s768_s2, %s600_s6  ;;  %s381_s19 = scalar_lea.vmem %s770_s4, %s609_s23  ;;  %v396_v1 = vld [vmem:[%s350_s9] sm:$0xff] (%p373_p5)  ;;  %v397_v4 = vld [vmem:[%s350_s9 + $0x8] sm:$0xff] (%p373_p5) }
  0x16   : > { %387 = vst [vmem:[%s381_s19] sm:$0xff] %v668_v0  ;;  %388 = vst [vmem:[%s381_s19 + $0x8] sm:$0xff] %v668_v0  ;;  %395 = sbr.rel (!%p373_p5) target bundleno = 33 (0x21), region = 40  ;;  %v398_v2 = vld [vmem:[%s366_s12] sm:$0xff] (%p373_p5)  ;;  %v399_v5 = vld [vmem:[%s366_s12 + $0x8] sm:$0xff] (%p373_p5) }
  0x17   : > { %v400_v3 = vsub.f32 (%p373_p5), %v396_v1, %v398_v2  ;;  %v401_v7 = vsub.f32 (%p373_p5), %v397_v4, %v399_v5 }
  0x19   : > { %v402_v8 = vand.u32 (%p373_p5), 2147483647, %v400_v3  ;;  %v403_v10 = vand.u32 (%p373_p5), 2147483647, %v401_v7 }
  0x1d   : > { %v404_v6 = vld [vmem:[%s381_s19] sm:$0xff]  ;;  %v405_v9 = vld [vmem:[%s381_s19 + $0x8] sm:$0xff] }
  0x1e   : > { %v408_v11 = vadd.f32 %v404_v6, %v402_v8  ;;  %v409_v12 = vadd.f32 %v405_v9, %v403_v10 }
  0x20   : > { %410 = vst [vmem:[%s381_s19] sm:$0xff] %v408_v11  ;;  %411 = vst [vmem:[%s381_s19 + $0x8] sm:$0xff] %v409_v12 }
  0x21 PF: > { %p413_p8 = pnand %p373_p5, %p324_p4 }
  0x23   : > { %416 = sbr.rel (%p413_p8) target bundleno = 85 (0x55), region = 44 }
  0x28   : > { %v417_v13 = vld [vmem:[%s730_s5] sm:$0xff] }
  0x29   : > { %v420_v14 = vand.u32 2147483647, %v417_v13  ;;  %v418_v21 = vsub.f32 0.0, %v417_v13  ;;  %v434_v28 = vld [vmem:[%s725_s28] sm:$0xff] }
  0x2b   : > { %v421_v15 = vsub.f32 0.0, %v420_v14  ;;  %v419_v25 = vmax.f32 %v418_v21, 0.0 }
  0x2d   : > { %v422_v16 = vmul.f32 1.442695, %v421_v15 }
  0x2f   : > { %636 = vpow2.f32 %v422_v16 }
  0x3c   : > { %v637_v17 = vpop.eup %636 }
  0x3d   : > { %v424_v18 = vadd.f32 1.0, %v637_v17  ;;  %v427_v19 = vmul.f32 -0.5, %v637_v17  ;;  %v430_v22 = vand.u32 2147483647, %v637_v17 }
  0x3f   : > { %638 = vlog2.f32 %v424_v18  ;;  %v428_v20 = vadd.f32 1.0, %v427_v19  ;;  %vm431_vm0 = vcmp.lt.f32.partialorder %v430_v22, 0.0004427343 }
  0x41   : > { %v429_v23 = vmul.f32 %v637_v17, %v428_v20 }
  0x4c   : > { %v639_v24 = vpop.eup %638 }
  0x4d   : > { %v426_v26 = vmul.f32 0.6931472, %v639_v24 }
  0x4f   : > { %v432_v27 = vsel %vm431_vm0, %v429_v23, %v426_v26 }
  0x50   : > { %v433_v29 = vadd.f32 %v432_v27, %v419_v25 }
  0x52   : > { %v436_v30 = vadd.f32 %v434_v28, %v433_v29 }
  0x54   : > { %437 = vst [vmem:[%s725_s28] sm:$0xff] %v436_v30 }
  0x55 PF: > { %p438_p9 = scmp.eq.s32.totalorder %s658_s15, 0 }
  0x57   : > { %p439_p10 = pnand %p438_p9, %p373_p5 }
  0x59   : > { %442 = sbr.rel (%p439_p10) target bundleno = 140 (0x8c), region = 48 }
  0x5e   : > { %v443_v31 = vld [vmem:[%s730_s5] sm:$0xff]  ;;  %v460_v39 = vlaneseq }
  0x5f   : > { %v446_v32 = vand.u32 2147483647, %v443_v31  ;;  %v444_v40 = vsub.f32 0.0, %v443_v31  ;;  %v470_v49 = vld [vmem:[%s725_s28] sm:$0xff] }
  0x60   : > { %v461_v43 = vshrl.u32 %v460_v39, 7 }
  0x61   : > { %v447_v33 = vsub.f32 0.0, %v446_v32  ;;  %v445_v45 = vmax.f32 %v444_v40, 0.0 }
  0x62   : > { %vm464_vm2 = vcmp.lt.s32.totalorder %v461_v43, 4 }
  0x63   : > { %v448_v34 = vmul.f32 1.442695, %v447_v33 }
  0x65   : > { %640 = vpow2.f32 %v448_v34 }
  0x72   : > { %v641_v35 = vpop.eup %640 }
  0x73   : > { %v450_v36 = vadd.f32 1.0, %v641_v35  ;;  %v453_v37 = vmul.f32 -0.5, %v641_v35  ;;  %v456_v41 = vand.u32 2147483647, %v641_v35 }
  0x75   : > { %642 = vlog2.f32 %v450_v36  ;;  %v454_v38 = vadd.f32 1.0, %v453_v37  ;;  %vm457_vm1 = vcmp.lt.f32.partialorder %v456_v41, 0.0004427343 }
  0x77   : > { %v455_v42 = vmul.f32 %v641_v35, %v454_v38 }
  0x82   : > { %v643_v44 = vpop.eup %642 }
  0x83   : > { %v452_v46 = vmul.f32 0.6931472, %v643_v44 }
  0x85   : > { %v458_v47 = vsel %vm457_vm1, %v455_v42, %v452_v46 }
  0x86   : > { %v459_v48 = vadd.f32 %v458_v47, %v445_v45 }
  0x88   : > { %v469_v50 = vsel %vm464_vm2, %v459_v48, 0.0 }
  0x89   : > { %v472_v51 = vadd.f32 %v470_v49, %v469_v50 }
  0x8b   : > { %473 = vst [vmem:[%s725_s28] sm:$0xff] %v472_v51 }
  0x8c PF: > { %s15_s17 = sadd.s32 1, %s666_s17   ;;  %s771_s15 = smov %s662_s16 }
  0x8d   : > { %p12_p11 = scmp.ge.s32.totalorder %s15_s17, 4   ;;  %s772_s16 = smov %s774_s18 }
  0x8f   :  { %14 = sbr.rel (!%p12_p11) target bundleno = 2 (0x2), region = 96 }

</bundles_post_ra>
